<compile_context>
chip_gen: v5e
topology: v5e:2x2
jax: 0.10.0
libtpu: 0.0.40
codegen_flags: <defaults>
</compile_context>

<pallas_src>
import functools

import jax
import jax.numpy as jnp
from jax import lax
from jax.experimental import pallas as pl
from jax.experimental.pallas import tpu as pltpu


# ---------------------------------------------------------------------------
# helpers
# ---------------------------------------------------------------------------

def _round_up(v: int, m: int) -> int:
    return ((v + m - 1) // m) * m


def _cdiv(a: int, b: int) -> int:
    return -(-a // b)


def _vmem_budget_bytes() -> int:
    """Per-core VMEM budget with headroom (v7x: 64 MiB phys, v5e/v6e: 128 MiB)."""
    cap = 64 << 20  # conservative default = smallest physical VMEM per core
    try:
        info = pltpu.get_tpu_info()
        cap = int(getattr(info, "vmem_capacity_bytes", cap))
    except Exception:
        pass
    cap = max(32 << 20, min(cap, 256 << 20))
    return (cap * 3) // 4          # leave headroom for Mosaic internals


def _pick_k_tiling(k: int, target_tk: int):
    """Lane-aligned K tile whose zero padding stays small (< 128 cols/step)."""
    k_pad128 = _round_up(k, 128)
    n_steps = _cdiv(k_pad128, max(128, target_tk))
    tk = _round_up(_cdiv(k_pad128, n_steps), 128)
    k_pad = tk * n_steps
    return tk, k_pad, n_steps


# ---------------------------------------------------------------------------
# kernels
# ---------------------------------------------------------------------------

def _gram_kernel_resident(x_ref, o_ref, acc_ref, *, inv_scale):
    """Full (a_pad, a_pad) output resident in VMEM; X streamed over K once.

    Grid = (nc, k_steps_per_part).  The single input ref feeds BOTH operands
    of the dot (no duplicate DMA of identical tiles).
    """
    kk = pl.program_id(1)

    @pl.when(kk == 0)
    def _():
        acc_ref[...] = jnp.zeros_like(acc_ref)

    xb = x_ref[...]
    acc_ref[...] += lax.dot_general(
        xb, xb,
        dimension_numbers=(((1,), (1,)), ((), ())),   # contract last axes: X @ X.T
        preferred_element_type=jnp.float32,
    )

    @pl.when(kk == pl.num_programs(1) - 1)
    def _():
        o_ref[...] = acc_ref[...] * inv_scale


def _gram_kernel_tiled(i_map_ref, j_map_ref, xi_ref, xj_ref, o_ref, acc_ref, *,
                       inv_scale):
    """Symmetric tiled path: only block pairs with i <= j are visited."""
    del i_map_ref, j_map_ref        # consumed by the index_maps (scalar prefetch)
    kk = pl.program_id(1)

    @pl.when(kk == 0)
    def _():
        acc_ref[...] = jnp.zeros_like(acc_ref)

    acc_ref[...] += lax.dot_general(
        xi_ref[...], xj_ref[...],
        dimension_numbers=(((1,), (1,)), ((), ())),
        preferred_element_type=jnp.float32,
    )

    @pl.when(kk == pl.num_programs(1) - 1)
    def _():
        o_ref[...] = acc_ref[...] * inv_scale


# ---------------------------------------------------------------------------
# wrapper paths
# ---------------------------------------------------------------------------

def _gram_resident(feature, a, k, *, budget):
    """Read-X-once path with the whole gram accumulator resident in VMEM."""
    in_itemsize = jnp.dtype(feature.dtype).itemsize
    a_pad = _round_up(max(a, 1), 128)      # lane-dense output, full MXU rows

    plan = None
    for target_tk in (2048, 1024, 512, 256):
        tk, k_pad, n_steps = _pick_k_tiling(k, target_tk)
        est = (2 * a_pad * tk * in_itemsize    # double-buffered input block
               + a_pad * a_pad * 4             # resident f32 accumulator
               + 2 * a_pad * a_pad * 4)        # f32 output block (conservative 2x)
        if est <= budget:
            plan = (tk, k_pad, n_steps, est)
            break
    if plan is None:
        return None                            # fall back to the tiled path
    tk, k_pad, n_steps, est = plan

    # Split K steps into two partial-sum outputs when possible so the leading
    # "parallel" axis gives both v7x TensorCores work; on single-TC chips this
    # costs only a tiny add epilogue.
    nc = 2 if (n_steps >= 2 and n_steps % 2 == 0) else 1
    spp = n_steps // nc

    if (a_pad, k_pad) != feature.shape:
        feature = jnp.pad(feature, ((0, a_pad - feature.shape[0]),
                                    (0, k_pad - feature.shape[1])))

    inv_scale = 1.0 / float(k)
    vmem_limit = int(min(budget, max(2 * est, 32 << 20)))
    cost = pl.CostEstimate(
        flops=2 * a_pad * a_pad * k_pad,
        transcendentals=0,
        bytes_accessed=a_pad * k_pad * in_itemsize + nc * a_pad * a_pad * 4,
    )

    out_parts = pl.pallas_call(
        functools.partial(_gram_kernel_resident, inv_scale=inv_scale),
        out_shape=jax.ShapeDtypeStruct((nc, a_pad, a_pad), jnp.float32),
        grid_spec=pltpu.PrefetchScalarGridSpec(
            num_scalar_prefetch=0,
            grid=(nc, spp),
            in_specs=[
                # One input operand; each (a_pad, tk) slab of X is DMA'd once.
                pl.BlockSpec((a_pad, tk), lambda c, kk: (0, c * spp + kk)),
            ],
            out_specs=pl.BlockSpec((None, a_pad, a_pad), lambda c, kk: (c, 0, 0)),
            scratch_shapes=[pltpu.VMEM((a_pad, a_pad), jnp.float32)],
        ),
        compiler_params=pltpu.CompilerParams(
            dimension_semantics=("parallel", "arbitrary"),
            vmem_limit_bytes=vmem_limit,
        ),
        cost_estimate=cost,
    )(feature)

    g = out_parts.sum(axis=0)                  # recombine the nc partial sums
    return g[:a, :a]


def _gram_tiled(feature, a, k, *, budget, tile_a, tile_k):
    """Large-A path: triangular (i<=j) block grid + mirror epilogue."""
    in_itemsize = jnp.dtype(feature.dtype).itemsize

    tm = min(int(tile_a), _round_up(max(a, 1), 128))
    tm = max(128, _round_up(tm, 128))          # 256 by default (MXU-wide on v6e/v7x)
    a_pad = _round_up(a, tm)
    nb = a_pad // tm

    tk = k_pad = n_steps = est = None
    for target_tk in (int(tile_k), 1024, 512, 256, 128):
        tk_c, k_pad_c, n_c = _pick_k_tiling(k, target_tk)
        est_c = (4 * tm * tk_c * in_itemsize   # two input specs, double-buffered
                 + 2 * tm * tm * 4             # output block, double-buffered
                 + tm * tm * 4)                # f32 accumulator scratch
        if est_c <= budget or target_tk == 128:
            tk, k_pad, n_steps, est = tk_c, k_pad_c, n_c, est_c
            break

    # Flattened upper-triangular block index maps (scalar prefetch -> SMEM).
    idx_i, idx_j = [], []
    for i in range(nb):
        for j in range(i, nb):
            idx_i.append(i)
            idx_j.append(j)
    num_pairs = len(idx_i)
    i_map = jnp.asarray(idx_i, dtype=jnp.int32)
    j_map = jnp.asarray(idx_j, dtype=jnp.int32)

    if (a_pad, k_pad) != feature.shape:
        feature = jnp.pad(feature, ((0, a_pad - feature.shape[0]),
                                    (0, k_pad - feature.shape[1])))

    inv_scale = 1.0 / float(k)
    vmem_limit = int(min(budget, max(2 * est, 32 << 20)))
    cost = pl.CostEstimate(
        flops=2 * num_pairs * tm * tm * k_pad,
        transcendentals=0,
        bytes_accessed=(2 * num_pairs * n_steps * tm * tk * in_itemsize
                        + num_pairs * tm * tm * 4),
    )

    # TODO(synk): if a profile shows exposed DMA latency on the K-streamed
    # operands, deepen their pipeline with pipeline_mode=pl.Buffered(3).
    out = pl.pallas_call(
        functools.partial(_gram_kernel_tiled, inv_scale=inv_scale),
        out_shape=jax.ShapeDtypeStruct((a_pad, a_pad), jnp.float32),
        grid_spec=pltpu.PrefetchScalarGridSpec(
            num_scalar_prefetch=2,
            grid=(num_pairs, n_steps),
            in_specs=[
                pl.BlockSpec((tm, tk), lambda p, kk, im, jm: (im[p], kk)),
                pl.BlockSpec((tm, tk), lambda p, kk, im, jm: (jm[p], kk)),
            ],
            out_specs=pl.BlockSpec((tm, tm), lambda p, kk, im, jm: (im[p], jm[p])),
            scratch_shapes=[pltpu.VMEM((tm, tm), jnp.float32)],
        ),
        compiler_params=pltpu.CompilerParams(
            dimension_semantics=("parallel", "arbitrary"),
            vmem_limit_bytes=vmem_limit,
        ),
        cost_estimate=cost,
    )(i_map, j_map, feature, feature)

    # Mirror the computed block-upper-triangle into the (unwritten) lower one.
    blk = jnp.arange(a_pad, dtype=jnp.int32) // tm
    upper = blk[:, None] <= blk[None, :]
    g = jnp.where(upper, out, out.T)
    return g[:a, :a]


# ---------------------------------------------------------------------------
# public entry point
# ---------------------------------------------------------------------------

def gram(x: jax.Array, *, tile_a: int = 256, tile_k: int = 2048,
         mxu_input_dtype=None, force_tiled: bool = False) -> jax.Array:
    """gram = (X.reshape(A, B*C) @ X.reshape(A, B*C).T) / (B*C)."""
    assert x.ndim == 3, "expected (a, b, c) input like the PyTorch module"
    a, b, c = x.shape
    k = b * c
    out_dtype = x.dtype

    feature = x.reshape(a, k)                  # glue reshape in plain JAX
    if mxu_input_dtype is not None:
        # Opt-in fast MXU feed (e.g. bf16 on v5e where f32 matmul is the slow
        # path); f32 accumulation is kept inside the kernels.
        feature = feature.astype(mxu_input_dtype)

    budget = _vmem_budget_bytes()

    g = None
    if not force_tiled:
        g = _gram_resident(feature, a, k, budget=budget)
    if g is None:
        g = _gram_tiled(feature, a, k, budget=budget,
                        tile_a=tile_a, tile_k=tile_k)
    return g.astype(out_dtype)


def gram_reference(x: jax.Array) -> jax.Array:
    a, b, c = x.shape
    feature = x.reshape(a, b * c).astype(jnp.float32)
    g = jnp.dot(feature, feature.T, precision=lax.Precision.HIGHEST)
    return (g / (b * c)).astype(x.dtype)


if __name__ == "__main__":
    key = jax.random.PRNGKey(0)
    k1, k2, k3 = jax.random.split(key, 3)

    def _check(out, ref, shape):
        assert out.shape == shape, out.shape
        err = float(jnp.max(jnp.abs(out.astype(jnp.float32) - ref.astype(jnp.float32))))
        assert jnp.allclose(out, ref, atol=2e-4, rtol=2e-4), err

    # 1) Small module-like input -> resident (read-X-once) path, single K part.
    x1 = jax.random.normal(k1, (8, 16, 16), dtype=jnp.float32)
    o1 = jax.block_until_ready(gram(x1))
    _check(o1, gram_reference(x1), (8, 8))

    # 2) Larger K -> resident path with the 2-way K split (two partial sums on
    #    the "parallel" leading axis for the v7x dual TensorCores).
    x2 = jax.random.normal(k2, (16, 64, 64), dtype=jnp.float32)
    o2 = jax.block_until_ready(gram(x2))
    _check(o2, gram_reference(x2), (16, 16))

    # 3) Force the large-A symmetric (triangular scalar-prefetch grid) path to
    #    exercise the block maps, K/A padding and the mirror epilogue.
    x3 = jax.random.normal(k3, (200, 12, 25), dtype=jnp.float32)
    o3 = jax.block_until_ready(gram(x3, tile_a=128, tile_k=256, force_tiled=True))
    _check(o3, gram_reference(x3), (200, 200))

    print("KERNEL_OK")
</pallas_src>

<mosaic_0001>
module attributes {stable_mosaic.version = 11 : i64} {
  func.func @_gram_kernel_resident(%arg0: i32, %arg1: i32, %arg2: memref<128x256xf32, #tpu.memory_space<vmem>>, %arg3: memref<1x128x128xf32, #tpu.memory_space<vmem>>, %arg4: memref<128x128xf32, #tpu.memory_space<vmem>>) attributes {dimension_semantics = [#tpu.dimension_semantics<parallel>, #tpu.dimension_semantics<arbitrary>], iteration_bounds = array<i64: 1, 1>, scalar_prefetch = 0 : i64, scratch_operands = 1 : i64, tpu.core_type = #tpu.core_type<tc>, window_params = [{transform_indices = @transform_0, window_bounds = array<i64: 128, 256>}, {transform_indices = @transform_1, window_bounds = array<i64: 1, 128, 128>}]} {
    %c0_i32 = arith.constant 0 : i32
    %0 = arith.cmpi eq, %arg1, %c0_i32 : i32
    %1 = arith.extui %0 : i1 to i32
    %c0_i32_0 = arith.constant 0 : i32
    %2 = arith.cmpi ne, %1, %c0_i32_0 : i32
    scf.if %2 {
      %cst_8 = arith.constant 0.000000e+00 : f32
      %11 = vector.broadcast %cst_8 : f32 to vector<128x128xf32>
      %c0_9 = arith.constant 0 : index
      %c0_10 = arith.constant 0 : index
      %12 = vector.load %arg4[%c0_9, %c0_10] : memref<128x128xf32, #tpu.memory_space<vmem>>, vector<128x128xf32>
      tpu.vector_store %arg4[%c0_9, %c0_10], %11 {strides = array<i32>} : memref<128x128xf32, #tpu.memory_space<vmem>>, vector<128x128xf32>,
    } else {
    }
    %c0 = arith.constant 0 : index
    %c0_1 = arith.constant 0 : index
    %3 = vector.load %arg2[%c0, %c0_1] : memref<128x256xf32, #tpu.memory_space<vmem>>, vector<128x256xf32>
    %c0_2 = arith.constant 0 : index
    %c0_3 = arith.constant 0 : index
    %4 = vector.load %arg4[%c0_2, %c0_3] : memref<128x128xf32, #tpu.memory_space<vmem>>, vector<128x128xf32>
    %cst = arith.constant dense<0.000000e+00> : vector<128x128xf32>
    %5 = tpu.matmul %3, %3, %cst {dimension_numbers = #tpu.dot_dimension_numbers<[1], [1], [0], [0], [0, 0, 1, 0], [], []>} : vector<128x256xf32>, vector<128x256xf32>, vector<128x128xf32> -> vector<128x128xf32>
    %6 = arith.addf %4, %5 : vector<128x128xf32>
    %c0_4 = arith.constant 0 : index
    %c0_5 = arith.constant 0 : index
    %7 = vector.load %arg4[%c0_4, %c0_5] : memref<128x128xf32, #tpu.memory_space<vmem>>, vector<128x128xf32>
    tpu.vector_store %arg4[%c0_4, %c0_5], %6 {strides = array<i32>} : memref<128x128xf32, #tpu.memory_space<vmem>>, vector<128x128xf32>,
    %c0_i32_6 = arith.constant 0 : i32
    %8 = arith.cmpi eq, %arg1, %c0_i32_6 : i32
    %9 = arith.extui %8 : i1 to i32
    %c0_i32_7 = arith.constant 0 : i32
    %10 = arith.cmpi ne, %9, %c0_i32_7 : i32
    scf.if %10 {
      %c0_8 = arith.constant 0 : index
      %c0_9 = arith.constant 0 : index
      %11 = vector.load %arg4[%c0_8, %c0_9] : memref<128x128xf32, #tpu.memory_space<vmem>>, vector<128x128xf32>
      %cst_10 = arith.constant 3.906250e-03 : f32
      %12 = vector.broadcast %cst_10 : f32 to vector<128x128xf32>
      %13 = arith.mulf %11, %12 : vector<128x128xf32>
      %c0_11 = arith.constant 0 : index
      %c0_12 = arith.constant 0 : index
      %c0_13 = arith.constant 0 : index
      %14 = vector.load %arg3[%c0_11, %c0_12, %c0_13] : memref<1x128x128xf32, #tpu.memory_space<vmem>>, vector<1x128x128xf32>
      %15 = vector.shape_cast %14 : vector<1x128x128xf32> to vector<128x128xf32>
      %16 = vector.shape_cast %13 : vector<128x128xf32> to vector<1x128x128xf32>
      tpu.vector_store %arg3[%c0_11, %c0_12, %c0_13], %16 {strides = array<i32>} : memref<1x128x128xf32, #tpu.memory_space<vmem>>, vector<1x128x128xf32>,
    } else {
    }
    return
  }
  func.func @transform_0(%arg0: i32, %arg1: i32) -> (i32, i32) {
    %c1_i32 = arith.constant 1 : i32
    %0 = arith.muli %arg0, %c1_i32 : i32
    %1 = arith.addi %0, %arg1 : i32
    %c0_i32 = arith.constant 0 : i32
    %c0_i32_0 = arith.constant 0 : i32
    return %c0_i32, %1 : i32, i32
  }
  func.func @transform_1(%arg0: i32, %arg1: i32) -> (i32, i32, i32) {
    %c0_i32 = arith.constant 0 : i32
    %c0_i32_0 = arith.constant 0 : i32
    %c0_i32_1 = arith.constant 0 : i32
    return %arg0, %c0_i32, %c0_i32_0 : i32, i32, i32
  }
}

</mosaic_0001>

<bundles_post_ra>
// kernel: tpu_custom_call.1
= control target key start
LH: loop header
LB: loop body
LE: loop exit
PB: predicated region body
PF: predicated region fallthrough
CT: control target
= control target key end

     0   :  { %6 = vsyncpa [#allocation4], 0  ;;  %s533_s0 = inlined_call_operand.hbm [shape: f32[128,256], index: 0, kind: input, shape index: {}]   ;;  %s534_s1 = inlined_call_operand.hbm [shape: f32[1,128,128], index: 1, kind: output, shape index: {}]  }
   0x1   :  { %7 = vsyncpa [#allocation5], 0  ;;  %s16_s8 = sshll.u32 %s533_s0, 4  ;;  %s421_s9 = smov [#allocation3]   ;;  %s17_s8 = int_to_ptr.hbm [resolvable:$true] %s16_s8 }
   0x2   :  { %s18_s10 = sshll.u32 %s421_s9, 4  ;;  %s422_s11 = smov 256   ;;  %s19_s10 = int_to_ptr.vmem [resolvable:$true] %s18_s10 }
   0x3   :  { %s423_s12 = smov 16  }
   0x4   :  { %24 = dma.hbm_to_vmem [thread:$0]  %s17_s8, 4096, %s19_s10, [#allocation4], %s422_s11, %s422_s11, %s423_s12  }
   0x5   :  { %417 = dma.done.wait [#allocation4], 4096  }
   0x6   :  { %418 = vsyncadd [#allocation4], 4294963200  ;;  %v440_v0 = vld [vmem:[#allocation3 + $0xf0] sm:$0xff]  ;;  %v442_v1 = vld [vmem:[#allocation3 + $0xf8] sm:$0xff]  ;;  %s424_s0 = smov [#allocation6]   ;;  %s318_s16 = sshll.u32 %s534_s1, 4  ;;  %s319_s16 = int_to_ptr.hbm [resolvable:$true] %s318_s16 }
   0x7   :  { %331 = vmatpush.xpose.msra.mxu2 %v440_v0  ;;  %347 = vmatpush.xpose.msra.mxu3 %v442_v1  ;;  %v446_v2 = vld [vmem:[#allocation3 + $0xe0] sm:$0xff]  ;;  %v448_v3 = vld [vmem:[#allocation3 + $0xe8] sm:$0xff]  ;;  %v454_v4 = vld [vmem:[#allocation3 + $0xd0] sm:$0xff]  ;;  %s316_s13 = sshll.u32 %s424_s0, 4  ;;  %s425_s17 = smov 128   ;;  %s317_s13 = int_to_ptr.vmem [resolvable:$true] %s316_s13 }
   0x8   :  { %99 = vmatpush.xpose.msra.mxu0 %v440_v0  ;;  %164 = vmatpush.xpose.msra.mxu1 %v442_v1  ;;  %v456_v5 = vld [vmem:[#allocation3 + $0xd8] sm:$0xff]  ;;  %v462_v6 = vld [vmem:[#allocation3 + $0xc0] sm:$0xff]  ;;  %v464_v7 = vld [vmem:[#allocation3 + $0xc8] sm:$0xff]  ;;  %s426_s18 = smov 8  }
   0x9   :  { %v470_v8 = vld [vmem:[#allocation3 + $0xb0] sm:$0xff]  ;;  %v472_v9 = vld [vmem:[#allocation3 + $0xb8] sm:$0xff]  ;;  %v478_v10 = vld [vmem:[#allocation3 + $0xa0] sm:$0xff] }
   0xa   :  { %v480_v11 = vld [vmem:[#allocation3 + $0xa8] sm:$0xff]  ;;  %v486_v12 = vld [vmem:[#allocation3 + $0x90] sm:$0xff]  ;;  %v488_v13 = vld [vmem:[#allocation3 + $0x98] sm:$0xff] }
   0xb   :  { %332 = vmatpush.xpose.msra.mxu2 %v446_v2  ;;  %348 = vmatpush.xpose.msra.mxu3 %v448_v3  ;;  %v67_v14 = vld [vmem:[#allocation3 + $0x80] sm:$0xff]  ;;  %v68_v15 = vld [vmem:[#allocation3 + $0x88] sm:$0xff]  ;;  %v496_v16 = vld [vmem:[#allocation3 + $0x70] sm:$0xff] }
   0xc   :  { %100 = vmatpush.xpose.msra.mxu0 %v446_v2  ;;  %165 = vmatpush.xpose.msra.mxu1 %v448_v3  ;;  %v498_v17 = vld [vmem:[#allocation3 + $0x78] sm:$0xff]  ;;  %v502_v18 = vld [vmem:[#allocation3 + $0x60] sm:$0xff]  ;;  %v504_v19 = vld [vmem:[#allocation3 + $0x68] sm:$0xff] }
   0xd   :  { %v61_v20 = vld [vmem:[#allocation3 + $0x50] sm:$0xff]  ;;  %v62_v21 = vld [vmem:[#allocation3 + $0x58] sm:$0xff]  ;;  %v59_v22 = vld [vmem:[#allocation3 + $0x40] sm:$0xff] }
   0xe   :  { %v60_v23 = vld [vmem:[#allocation3 + $0x48] sm:$0xff]  ;;  %v57_v24 = vld [vmem:[#allocation3 + $0x30] sm:$0xff]  ;;  %v58_v25 = vld [vmem:[#allocation3 + $0x38] sm:$0xff] }
   0xf   :  { %333 = vmatpush.xpose.msra.mxu2 %v454_v4  ;;  %349 = vmatpush.xpose.msra.mxu3 %v456_v5  ;;  %v55_v26 = vld [vmem:[#allocation3 + $0x20] sm:$0xff]  ;;  %v56_v27 = vld [vmem:[#allocation3 + $0x28] sm:$0xff]  ;;  %v53_v28 = vld [vmem:[#allocation3 + $0x10] sm:$0xff] }
  0x10   :  { %101 = vmatpush.xpose.msra.mxu0 %v454_v4  ;;  %166 = vmatpush.xpose.msra.mxu1 %v456_v5  ;;  %v54_v29 = vld [vmem:[#allocation3 + $0x18] sm:$0xff]  ;;  %v51_v30 = vld [vmem:[#allocation3] sm:$0xff]  ;;  %v52_v31 = vld [vmem:[#allocation3 + $0x8] sm:$0xff] }
  0x13   :  { %334 = vmatpush.xpose.msra.mxu2 %v462_v6  ;;  %350 = vmatpush.xpose.msra.mxu3 %v464_v7 }
  0x14   :  { %102 = vmatpush.xpose.msra.mxu0 %v462_v6  ;;  %167 = vmatpush.xpose.msra.mxu1 %v464_v7 }
  0x17   :  { %335 = vmatpush.xpose.msra.mxu2 %v470_v8  ;;  %351 = vmatpush.xpose.msra.mxu3 %v472_v9 }
  0x18   :  { %103 = vmatpush.xpose.msra.mxu0 %v470_v8  ;;  %168 = vmatpush.xpose.msra.mxu1 %v472_v9 }
  0x1b   :  { %336 = vmatpush.xpose.msra.mxu2 %v478_v10  ;;  %352 = vmatpush.xpose.msra.mxu3 %v480_v11 }
  0x1c   :  { %104 = vmatpush.xpose.msra.mxu0 %v478_v10  ;;  %169 = vmatpush.xpose.msra.mxu1 %v480_v11 }
  0x1f   :  { %337 = vmatpush.xpose.msra.mxu2 %v486_v12  ;;  %353 = vmatpush.xpose.msra.mxu3 %v488_v13 }
  0x20   :  { %105 = vmatpush.xpose.msra.mxu0 %v486_v12  ;;  %170 = vmatpush.xpose.msra.mxu1 %v488_v13 }
  0x23   :  { %338 = vmatpush.xpose.msra.mxu2 %v67_v14  ;;  %354 = vmatpush.xpose.msra.mxu3 %v68_v15 }
  0x24   :  { %106 = vmatpush.xpose.msra.mxu0 %v67_v14  ;;  %171 = vmatpush.xpose.msra.mxu1 %v68_v15 }
  0x27   :  { %339 = vmatpush.xpose.msra.mxu2 %v496_v16  ;;  %355 = vmatpush.xpose.msra.mxu3 %v498_v17 }
  0x28   :  { %107 = vmatpush.xpose.msra.mxu0 %v496_v16  ;;  %172 = vmatpush.xpose.msra.mxu1 %v498_v17 }
  0x2b   :  { %340 = vmatpush.xpose.msra.mxu2 %v502_v18  ;;  %356 = vmatpush.xpose.msra.mxu3 %v504_v19 }
  0x2c   :  { %108 = vmatpush.xpose.msra.mxu0 %v502_v18  ;;  %173 = vmatpush.xpose.msra.mxu1 %v504_v19 }
  0x2f   :  { %341 = vmatpush.xpose.msra.mxu2 %v61_v20  ;;  %357 = vmatpush.xpose.msra.mxu3 %v62_v21 }
  0x30   :  { %109 = vmatpush.xpose.msra.mxu0 %v61_v20  ;;  %174 = vmatpush.xpose.msra.mxu1 %v62_v21 }
  0x33   :  { %342 = vmatpush.xpose.msra.mxu2 %v59_v22  ;;  %358 = vmatpush.xpose.msra.mxu3 %v60_v23 }
  0x34   :  { %110 = vmatpush.xpose.msra.mxu0 %v59_v22  ;;  %175 = vmatpush.xpose.msra.mxu1 %v60_v23 }
  0x37   :  { %343 = vmatpush.xpose.msra.mxu2 %v57_v24  ;;  %359 = vmatpush.xpose.msra.mxu3 %v58_v25 }
  0x38   :  { %111 = vmatpush.xpose.msra.mxu0 %v57_v24  ;;  %176 = vmatpush.xpose.msra.mxu1 %v58_v25 }
  0x3b   :  { %344 = vmatpush.xpose.msra.mxu2 %v55_v26  ;;  %360 = vmatpush.xpose.msra.mxu3 %v56_v27 }
  0x3c   :  { %112 = vmatpush.xpose.msra.mxu0 %v55_v26  ;;  %177 = vmatpush.xpose.msra.mxu1 %v56_v27 }
  0x3f   :  { %345 = vmatpush.xpose.msra.mxu2 %v53_v28  ;;  %361 = vmatpush.xpose.msra.mxu3 %v54_v29 }
  0x40   :  { %113 = vmatpush.xpose.msra.mxu0 %v53_v28  ;;  %178 = vmatpush.xpose.msra.mxu1 %v54_v29 }
  0x43   :  { %346 = vmatpush.xpose.msra.mxu2 %v51_v30  ;;  %362 = vmatpush.xpose.msra.mxu3 %v52_v31 }
  0x44   :  { %114 = vmatpush.xpose.msra.mxu0 %v51_v30  ;;  %179 = vmatpush.xpose.msra.mxu1 %v52_v31 }
  0x46   :  { %139 = vmatmul.f32.vlgmr.msra.gmra.mxu2 %v67_v14  ;;  %204 = vmatmul.f32.vlgmr.msra.gmra.mxu3 %v68_v15 }
  0x47   :  { %115 = vmatmul.f32.vlgmr.msra.gmra.mxu0 %v51_v30  ;;  %180 = vmatmul.f32.vlgmr.msra.gmra.mxu1 %v52_v31 }
  0x4e   :  { %142 = vmatmul.f32.gmra.mxu2 %v486_v12  ;;  %207 = vmatmul.f32.gmra.mxu3 %v488_v13 }
  0x4f   :  { %118 = vmatmul.f32.gmra.mxu0 %v53_v28  ;;  %183 = vmatmul.f32.gmra.mxu1 %v54_v29 }
  0x56   :  { %145 = vmatmul.f32.gmra.mxu2 %v478_v10  ;;  %210 = vmatmul.f32.gmra.mxu3 %v480_v11 }
  0x57   :  { %121 = vmatmul.f32.gmra.mxu0 %v55_v26  ;;  %186 = vmatmul.f32.gmra.mxu1 %v56_v27 }
  0x5e   :  { %148 = vmatmul.f32.gmra.mxu2 %v470_v8  ;;  %213 = vmatmul.f32.gmra.mxu3 %v472_v9 }
  0x5f   :  { %124 = vmatmul.f32.gmra.mxu0 %v57_v24  ;;  %189 = vmatmul.f32.gmra.mxu1 %v58_v25 }
  0x66   :  { %151 = vmatmul.f32.gmra.mxu2 %v462_v6  ;;  %216 = vmatmul.f32.gmra.mxu3 %v464_v7 }
  0x67   :  { %127 = vmatmul.f32.gmra.mxu0 %v59_v22  ;;  %192 = vmatmul.f32.gmra.mxu1 %v60_v23 }
  0x6e   :  { %154 = vmatmul.f32.gmra.mxu2 %v454_v4  ;;  %219 = vmatmul.f32.gmra.mxu3 %v456_v5 }
  0x6f   :  { %130 = vmatmul.f32.gmra.mxu0 %v61_v20  ;;  %195 = vmatmul.f32.gmra.mxu1 %v62_v21 }
  0x76   :  { %157 = vmatmul.f32.gmra.mxu2 %v446_v2  ;;  %222 = vmatmul.f32.gmra.mxu3 %v448_v3 }
  0x77   :  { %133 = vmatmul.f32.gmra.mxu0 %v502_v18  ;;  %198 = vmatmul.f32.gmra.mxu1 %v504_v19 }
  0x7e   :  { %160 = vmatmul.f32.gmra.mxu2 %v440_v0  ;;  %225 = vmatmul.f32.gmra.mxu3 %v442_v1 }
  0x7f   :  { %136 = vmatmul.f32.gmra.mxu0 %v496_v16  ;;  %201 = vmatmul.f32.gmra.mxu1 %v498_v17 }
  0xc4   :  { %v116_v32 = vpop.f32.mrf.mxu0  ;;  %v181_v33 = vpop.f32.mrf.mxu1 }
  0xc5   :  { %v182_v34 = vadd.f32 %v181_v33, %v116_v32 }
  0xc7   :  { %v280_v35 = vmul.f32 0.00390625, %v182_v34 }
  0xc9   :  { %v140_v36 = vpop.f32.mrf.mxu2  ;;  %296 = vst [vmem:[#allocation6] sm:$0xff] %v280_v35  ;;  %v205_v37 = vpop.f32.mrf.mxu3 }
  0xca   :  { %v206_v38 = vadd.f32 %v205_v37, %v140_v36 }
  0xcc   :  { %v288_v39 = vmul.f32 0.00390625, %v206_v38  ;;  %v119_v40 = vpop.f32.mrf.mxu0  ;;  %v184_v41 = vpop.f32.mrf.mxu1 }
  0xcd   :  { %v185_v42 = vadd.f32 %v184_v41, %v119_v40 }
  0xce   :  { %304 = vst [vmem:[#allocation6 + $0x40] sm:$0xff] %v288_v39 }
  0xcf   :  { %v281_v43 = vmul.f32 0.00390625, %v185_v42 }
  0xd1   :  { %v143_v44 = vpop.f32.mrf.mxu2  ;;  %297 = vst [vmem:[#allocation6 + $0x8] sm:$0xff] %v281_v43  ;;  %v208_v45 = vpop.f32.mrf.mxu3 }
  0xd2   :  { %v209_v46 = vadd.f32 %v208_v45, %v143_v44 }
  0xd4   :  { %v289_v47 = vmul.f32 0.00390625, %v209_v46  ;;  %v122_v48 = vpop.f32.mrf.mxu0  ;;  %v187_v49 = vpop.f32.mrf.mxu1 }
  0xd5   :  { %v188_v50 = vadd.f32 %v187_v49, %v122_v48 }
  0xd6   :  { %305 = vst [vmem:[#allocation6 + $0x48] sm:$0xff] %v289_v47 }
  0xd7   :  { %v282_v51 = vmul.f32 0.00390625, %v188_v50 }
  0xd9   :  { %v146_v52 = vpop.f32.mrf.mxu2  ;;  %298 = vst [vmem:[#allocation6 + $0x10] sm:$0xff] %v282_v51  ;;  %v211_v53 = vpop.f32.mrf.mxu3 }
  0xda   :  { %v212_v54 = vadd.f32 %v211_v53, %v146_v52 }
  0xdc   :  { %v290_v55 = vmul.f32 0.00390625, %v212_v54  ;;  %v125_v56 = vpop.f32.mrf.mxu0  ;;  %v190_v57 = vpop.f32.mrf.mxu1 }
  0xdd   :  { %v191_v58 = vadd.f32 %v190_v57, %v125_v56 }
  0xde   :  { %306 = vst [vmem:[#allocation6 + $0x50] sm:$0xff] %v290_v55 }
  0xdf   :  { %v283_v59 = vmul.f32 0.00390625, %v191_v58 }
  0xe1   :  { %v149_v60 = vpop.f32.mrf.mxu2  ;;  %299 = vst [vmem:[#allocation6 + $0x18] sm:$0xff] %v283_v59  ;;  %v214_v61 = vpop.f32.mrf.mxu3 }
  0xe2   :  { %v215_v62 = vadd.f32 %v214_v61, %v149_v60 }
  0xe4   :  { %v291_v63 = vmul.f32 0.00390625, %v215_v62  ;;  %v128_v0 = vpop.f32.mrf.mxu0  ;;  %v193_v1 = vpop.f32.mrf.mxu1 }
  0xe5   :  { %v194_v2 = vadd.f32 %v193_v1, %v128_v0 }
  0xe6   :  { %307 = vst [vmem:[#allocation6 + $0x58] sm:$0xff] %v291_v63 }
  0xe7   :  { %v284_v3 = vmul.f32 0.00390625, %v194_v2 }
  0xe9   :  { %v152_v4 = vpop.f32.mrf.mxu2  ;;  %300 = vst [vmem:[#allocation6 + $0x20] sm:$0xff] %v284_v3  ;;  %v217_v5 = vpop.f32.mrf.mxu3 }
  0xea   :  { %v218_v6 = vadd.f32 %v217_v5, %v152_v4 }
  0xec   :  { %v292_v7 = vmul.f32 0.00390625, %v218_v6  ;;  %v131_v8 = vpop.f32.mrf.mxu0  ;;  %v196_v9 = vpop.f32.mrf.mxu1 }
  0xed   :  { %v197_v10 = vadd.f32 %v196_v9, %v131_v8 }
  0xee   :  { %308 = vst [vmem:[#allocation6 + $0x60] sm:$0xff] %v292_v7 }
  0xef   :  { %v285_v11 = vmul.f32 0.00390625, %v197_v10 }
  0xf1   :  { %v155_v12 = vpop.f32.mrf.mxu2  ;;  %301 = vst [vmem:[#allocation6 + $0x28] sm:$0xff] %v285_v11  ;;  %v220_v13 = vpop.f32.mrf.mxu3 }
  0xf2   :  { %v221_v14 = vadd.f32 %v220_v13, %v155_v12 }
  0xf4   :  { %v293_v15 = vmul.f32 0.00390625, %v221_v14  ;;  %v134_v16 = vpop.f32.mrf.mxu0  ;;  %v199_v17 = vpop.f32.mrf.mxu1 }
  0xf5   :  { %v200_v18 = vadd.f32 %v199_v17, %v134_v16 }
  0xf6   :  { %309 = vst [vmem:[#allocation6 + $0x68] sm:$0xff] %v293_v15 }
  0xf7   :  { %v286_v19 = vmul.f32 0.00390625, %v200_v18 }
  0xf9   :  { %v158_v20 = vpop.f32.mrf.mxu2  ;;  %302 = vst [vmem:[#allocation6 + $0x30] sm:$0xff] %v286_v19  ;;  %v223_v21 = vpop.f32.mrf.mxu3 }
  0xfa   :  { %v224_v22 = vadd.f32 %v223_v21, %v158_v20 }
  0xfc   :  { %v294_v23 = vmul.f32 0.00390625, %v224_v22  ;;  %v137_v24 = vpop.f32.mrf.mxu0  ;;  %v202_v25 = vpop.f32.mrf.mxu1 }
  0xfd   :  { %v203_v26 = vadd.f32 %v202_v25, %v137_v24 }
  0xfe   :  { %310 = vst [vmem:[#allocation6 + $0x70] sm:$0xff] %v294_v23 }
  0xff   :  { %v287_v27 = vmul.f32 0.00390625, %v203_v26 }
 0x101   :  { %v161_v28 = vpop.f32.mrf.mxu2  ;;  %303 = vst [vmem:[#allocation6 + $0x38] sm:$0xff] %v287_v27  ;;  %v226_v29 = vpop.f32.mrf.mxu3 }
 0x102   :  { %v227_v30 = vadd.f32 %v226_v29, %v161_v28 }
 0x104   :  { %v295_v31 = vmul.f32 0.00390625, %v227_v30 }
 0x106   :  { %311 = vst [vmem:[#allocation6 + $0x78] sm:$0xff] %v295_v31 }
 0x107   :  { %324 = dma.vmem_to_hbm [thread:$0]  %s317_s13, 2048, %s319_s16, [#allocation5], %s425_s17, %s425_s17, %s426_s18  }
 0x108   :  { %419 = dma.done.wait [#allocation5], 2048  }
 0x109   :  { %420 = vsyncadd [#allocation5], 4294965248 }
 0x10a   :  { %329 = vsyncpa [#allocation4], 1 }
 0x10b   :  { %330 = vsyncpa [#allocation5], 1 }

</bundles_post_ra>
